<compile_context>
chip_gen: v6e
topology: v6e:2x2x1
jax: 0.10.0
libtpu: 0.0.40
codegen_flags: <defaults>
</compile_context>

<pallas_src>
import functools

import jax
import jax.numpy as jnp
from jax import lax
from jax.experimental import pallas as pl
from jax.experimental.pallas import tpu as pltpu


def _fused_kernel(x_ref, w_ref, b_ref, o_ref, *, h, w):
    nb, c, hw = x_ref.shape
    wt = w_ref[...]                    # (Co, C)  weight stays resident across steps
    bias = b_ref[...]                  # (Co, 1)  broadcasts along lanes of (Co, HW)

    # Static unrolled loop over the batch block; iterations are independent so the
    # scheduler can overlap XLU transposes, VPU/EUP softmax and MXU matmuls.
    for i in range(nb):
        xc = x_ref[i]                  # (C, HW)  lane dim = H*W (free reshape of NCHW)
        xt = xc.T                      # (HW, C)  XLU transpose, both dims tile-aligned

        # Numerically-stable softmax over W as a sublane-group reduction:
        # (HW, C) -> (H, W, C) is a pure vreg regroup since W is a multiple of 8.
        xr = xt.reshape(h, w, c)
        m = jnp.max(xr, axis=1, keepdims=True)        # (H, 1, C)
        e = jnp.exp(xr - m)
        s = jnp.sum(e, axis=1, keepdims=True)         # (H, 1, C)
        p = (e / s).reshape(hw, c)                    # exact divide for f32 parity

        # dropout -> eval identity; relu(softmax) elided (p >= 0).

        # 1x1 conv as a trans-B MXU matmul that directly yields the lane-dense
        # (Co, HW) tile: no output transpose, unmasked full-width stores.
        y = lax.dot_general(
            wt, p, (((1,), (1,)), ((), ())),
            preferred_element_type=jnp.float32)       # (Co, HW)
        o_ref[i] = jnp.maximum(y + bias, 0.0).astype(o_ref.dtype)


def _pick_batch_block(n):
    # Target ~1-2 MiB of input per grid step (~8-16 batches at 128 KiB each) to
    # amortize per-step pipeline overhead, while keeping >= 2 grid steps whenever
    # N >= 2 so both v7x TensorCores get work. VMEM stays far below the scoped
    # limit even at nb=16 (double-buffered in+out ~ 6 MiB).
    if n <= 1:
        return 1
    best = 1
    for cand in range(2, min(n // 2, 16) + 1):
        if n % cand == 0:
            best = cand
    return best


def model_forward(x, w, b):
    n, c, h, wd = x.shape
    co = w.shape[0]
    hw = h * wd
    nb = _pick_batch_block(n)

    x3 = x.reshape(n, c, hw)                    # free metadata reshape of NCHW
    wt = w.astype(jnp.float32)                  # (Co, C)
    b2 = b.reshape(co, 1).astype(jnp.float32)   # (Co, 1)

    kernel = functools.partial(_fused_kernel, h=h, w=wd)

    out = pl.pallas_call(
        kernel,
        out_shape=jax.ShapeDtypeStruct((n, co, hw), x.dtype),
        grid_spec=pltpu.PrefetchScalarGridSpec(
            num_scalar_prefetch=0,
            grid=(n // nb,),
            in_specs=[
                pl.BlockSpec((nb, c, hw), lambda i: (i, 0, 0)),
                pl.BlockSpec((co, c), lambda i: (0, 0)),
                pl.BlockSpec((co, 1), lambda i: (0, 0)),
            ],
            out_specs=pl.BlockSpec((nb, co, hw), lambda i: (i, 0, 0)),
        ),
        compiler_params=pltpu.CompilerParams(
            dimension_semantics=("parallel",),
        ),
    )(x3, wt, b2)

    # (N, Co, H*W) -> (N, Co, H, W) is a free reshape (no transpose / extra HBM pass).
    return out.reshape(n, co, h, wd)


def reference(x, w, b):
    sm = jax.nn.softmax(x, axis=-1)
    x4 = jnp.maximum(sm, 0.0)
    y = jnp.einsum("oc,nchw->nohw", w, x4,
                   precision=lax.Precision.HIGHEST) + b[None, :, None, None]
    return jnp.maximum(y, 0.0)


if __name__ == "__main__":
    # Conv is fixed 128 -> 64 channels (1x1), so keep C=128, Co=64; shrink
    # batch/spatial for a small deterministic test.
    N, C, H, W = 2, 128, 16, 16
    Co = 64

    key = jax.random.PRNGKey(0)
    kx, kw, kb = jax.random.split(key, 3)
    x = jax.random.normal(kx, (N, C, H, W), dtype=jnp.float32)
    bound = 1.0 / jnp.sqrt(jnp.float32(C))
    w = jax.random.uniform(kw, (Co, C), jnp.float32, -bound, bound)
    b = jax.random.uniform(kb, (Co,), jnp.float32, -bound, bound)

    out = jax.block_until_ready(model_forward(x, w, b))
    ref = reference(x, w, b)

    assert out.shape == (N, Co, H, W)
    assert jnp.allclose(out, ref, atol=2e-5, rtol=2e-5)
    print("KERNEL_OK")
</pallas_src>

<mosaic_0001>
module attributes {stable_mosaic.version = 11 : i64} {
  func.func @_fused_kernel(%arg0: i32, %arg1: memref<1x128x256xf32, #tpu.memory_space<vmem>>, %arg2: memref<64x128xf32, #tpu.memory_space<vmem>>, %arg3: memref<64x1xf32, #tpu.memory_space<vmem>>, %arg4: memref<1x64x256xf32, #tpu.memory_space<vmem>>) attributes {dimension_semantics = [#tpu.dimension_semantics<parallel>], iteration_bounds = array<i64: 2>, scalar_prefetch = 0 : i64, scratch_operands = 0 : i64, tpu.core_type = #tpu.core_type<tc>, window_params = [{transform_indices = @transform_0, window_bounds = array<i64: 1, 128, 256>}, {pipeline_mode = #tpu.pipeline_mode<synchronous>, transform_indices = @transform_1, window_bounds = array<i64: 64, 128>}, {pipeline_mode = #tpu.pipeline_mode<synchronous>, transform_indices = @transform_2, window_bounds = array<i64: 64, 1>}, {transform_indices = @transform_3, window_bounds = array<i64: 1, 64, 256>}]} {
    %c0 = arith.constant 0 : index
    %c0_0 = arith.constant 0 : index
    %0 = vector.load %arg2[%c0, %c0_0] : memref<64x128xf32, #tpu.memory_space<vmem>>, vector<64x128xf32>
    %c0_1 = arith.constant 0 : index
    %c0_2 = arith.constant 0 : index
    %1 = vector.load %arg3[%c0_1, %c0_2] : memref<64x1xf32, #tpu.memory_space<vmem>>, vector<64x1xf32>
    %c0_3 = arith.constant 0 : index
    %c0_4 = arith.constant 0 : index
    %c0_5 = arith.constant 0 : index
    %2 = vector.load %arg1[%c0_3, %c0_4, %c0_5] : memref<1x128x256xf32, #tpu.memory_space<vmem>>, vector<1x128x256xf32>
    %3 = vector.shape_cast %2 : vector<1x128x256xf32> to vector<128x256xf32>
    %4 = tpu.transpose %3, [1, 0] : vector<128x256xf32> -> vector<256x128xf32>
    %5 = vector.shape_cast %4 : vector<256x128xf32> to vector<16x16x128xf32>
    %cst = arith.constant dense<0xFF800000> : vector<16x128xf32>
    %6 = vector.multi_reduction <maximumf>, %5, %cst [1] : vector<16x16x128xf32> to vector<16x128xf32>
    %7 = vector.shape_cast %6 : vector<16x128xf32> to vector<16x1x128xf32>
    %8 = vector.broadcast %7 : vector<16x1x128xf32> to vector<16x16x128xf32>
    %9 = arith.subf %5, %8 : vector<16x16x128xf32>
    %10 = math.exp %9 : vector<16x16x128xf32>
    %cst_6 = arith.constant dense<0.000000e+00> : vector<16x128xf32>
    %11 = vector.multi_reduction <add>, %10, %cst_6 [1] : vector<16x16x128xf32> to vector<16x128xf32>
    %12 = vector.shape_cast %11 : vector<16x128xf32> to vector<16x1x128xf32>
    %13 = vector.broadcast %12 : vector<16x1x128xf32> to vector<16x16x128xf32>
    %14 = arith.divf %10, %13 : vector<16x16x128xf32>
    %15 = vector.shape_cast %14 : vector<16x16x128xf32> to vector<256x128xf32>
    %cst_7 = arith.constant dense<0.000000e+00> : vector<64x256xf32>
    %16 = tpu.matmul %0, %15, %cst_7 {dimension_numbers = #tpu.dot_dimension_numbers<[1], [1], [0], [0], [0, 0, 1, 0], [], []>} : vector<64x128xf32>, vector<256x128xf32>, vector<64x256xf32> -> vector<64x256xf32>
    %17 = vector.broadcast %1 : vector<64x1xf32> to vector<64x256xf32>
    %18 = arith.addf %16, %17 : vector<64x256xf32>
    %cst_8 = arith.constant 0.000000e+00 : f32
    %19 = vector.broadcast %cst_8 : f32 to vector<64x256xf32>
    %20 = arith.maximumf %18, %19 : vector<64x256xf32>
    %c0_9 = arith.constant 0 : index
    %c0_10 = arith.constant 0 : index
    %c0_11 = arith.constant 0 : index
    %21 = vector.load %arg4[%c0_9, %c0_10, %c0_11] : memref<1x64x256xf32, #tpu.memory_space<vmem>>, vector<1x64x256xf32>
    %22 = vector.shape_cast %21 : vector<1x64x256xf32> to vector<64x256xf32>
    %23 = vector.shape_cast %20 : vector<64x256xf32> to vector<1x64x256xf32>
    tpu.vector_store %arg4[%c0_9, %c0_10, %c0_11], %23 {strides = array<i32>} : memref<1x64x256xf32, #tpu.memory_space<vmem>>, vector<1x64x256xf32>,
    return
  }
  func.func @transform_0(%arg0: i32) -> (i32, i32, i32) {
    %c0_i32 = arith.constant 0 : i32
    %c0_i32_0 = arith.constant 0 : i32
    %c0_i32_1 = arith.constant 0 : i32
    return %arg0, %c0_i32, %c0_i32_0 : i32, i32, i32
  }
  func.func @transform_1(%arg0: i32) -> (i32, i32) {
    %c0_i32 = arith.constant 0 : i32
    %c0_i32_0 = arith.constant 0 : i32
    %c0_i32_1 = arith.constant 0 : i32
    return %c0_i32, %c0_i32_0 : i32, i32
  }
  func.func @transform_2(%arg0: i32) -> (i32, i32) {
    %c0_i32 = arith.constant 0 : i32
    %c0_i32_0 = arith.constant 0 : i32
    %c0_i32_1 = arith.constant 0 : i32
    return %c0_i32, %c0_i32_0 : i32, i32
  }
  func.func @transform_3(%arg0: i32) -> (i32, i32, i32) {
    %c0_i32 = arith.constant 0 : i32
    %c0_i32_0 = arith.constant 0 : i32
    %c0_i32_1 = arith.constant 0 : i32
    return %arg0, %c0_i32, %c0_i32_0 : i32, i32, i32
  }
}

</mosaic_0001>

<bundles_post_ra>
// kernel: tpu_custom_call.1
= control target key start
LH: loop header
LB: loop body
LE: loop exit
PB: predicated region body
PF: predicated region fallthrough
CT: control target
= control target key end

     0   :  { %8 = vsyncpa [#allocation3], 0  ;;  %s1918_s0 = inlined_call_operand.hbm [shape: f32[2,128,256], index: 0, kind: input, shape index: {}]   ;;  %s1919_s1 = inlined_call_operand.vmem [shape: f32[64,128], index: 1, kind: input, shape index: {}]   ;;  %s1920_s2 = inlined_call_operand.vmem [shape: f32[64,1], index: 2, kind: input, shape index: {}]   ;;  %s1921_s3 = inlined_call_operand.hbm [shape: f32[2,64,256], index: 3, kind: output, shape index: {}]  }
   0x1   :  { %10 = vsyncpa [#allocation3 + $0x1], 0 }
   0x2   :  { %11 = vsyncpa [#allocation4], 0 }
   0x3   :  { %13 = vsyncpa [#allocation4 + $0x1], 0  ;;  %s1307_s12 = smov 0   ;;  %s1309_s13 = smov 0  }
   0x4   :  { %s1311_s14 = smov 0   ;;  %s1313_s15 = smov 0  }
   0x5 LB: > { %s1328_s16 = sadd.s32 4294967295, %s1278_s15   ;;  %s941_s17 = sadd.s32 4294967294, %s1278_s15   ;;  %s1278_s15 = sphi %s1313_s15, %s1966_s15   ;;  %s1274_s14 = sphi %s1311_s14, %s1965_s14   ;;  %s1270_s13 = sphi %s1309_s13, %s1964_s13   ;;  %s1266_s12 = sphi %s1307_s12, %s1963_s12  }
   0x6   : > { %s1332_s18 = sadd.s32 1, %s1278_s15   ;;  %s26_s19 = sadd.s32 1, %s1274_s14 }
   0x7   : > { %s23_s20 = ssub.s32 %s1278_s15, %s1332_s18  ;;  %p33_p0 = scmp.ne.s32.totalorder %s1274_s14, %s1270_s13 }
   0x8   : > { %p24_p1 = scmp.eq.s32.totalorder %s23_s20, 0  ;;  %p34_p2 = scmp.eq.s32.totalorder %s1278_s15, 0 }
   0x9   : > { %p39_p3 = scmp.ne.s32.totalorder %s1270_s13, %s1266_s12  ;;  %p40_p4 = scmp.eq.s32.totalorder %s1328_s16, 0 }
   0xa   : > { %s1344_s21 = scalar_select %p24_p1, %s1274_s14, %s26_s19  }
   0xb   : > { %p1346_p5 = por %p34_p2, %p33_p0  ;;  %p1350_p6 = por %p40_p4, %p39_p3 }
   0xc   : > { %p105_p7 = scmp.eq.s32.totalorder %s1328_s16, 1  ;;  %p111_p8 = scmp.eq.s32.totalorder %s941_s17, 1 }
   0xd   : > { %s1934_s23 = scalar_select %p1350_p6, 1, 0 }
   0xe   : > { %p1049_p10 = scmp.lt.s32.totalorder %s1278_s15, 2  ;;  %p1357_p11 = por %p105_p7, %p33_p0 }
   0xf   : > { %p1361_p12 = por %p111_p8, %p39_p3  ;;  %s137_s26 = sand.u32 1, %s1274_s14  }
  0x10   : > { %s1935_s24 = scalar_select %p1357_p11, 1, 0 }
  0x11   : > { %s1936_s25 = scalar_select %p1361_p12, 1, 0 }
  0x12   : > { %s955_s27 = sshll.u32 %s1278_s15, 12  ;;  %s944_s28 = sshll.u32 %s137_s26, 8 }
  0x13   : > { %s1370_s4 = scalar_lea.hbm %s1918_s0, %s955_s27  ;;  %s141_s5 = scalar_lea.vmem [#allocation2], %s944_s28 }
  0x14   : > { %s148_s6 = sshll.u32 %s141_s5, 4  ;;  %p1374_p13 = pnand %p1049_p10, %p1346_p5  ;;  %s1378_s6 = int_to_ptr.vmem [resolvable:$true] %s148_s6 }
  0x15   : > { %s1380_s8 = scalar_lea.sflag [#allocation3], %s137_s26  ;;  %s1186_s9 = scalar_lea.hbm %s1370_s4, 4096 }
  0x16   : > { %p1187_p0 = scmp.ne.s32.totalorder %s1370_s4, %s1186_s9  ;;  %p1188_p1 = pneg %p1374_p13 }
  0x17   : > { %s1191_s17 = scalar_lea.hbm %s1918_s0, 8192  ;;  %p1192_p4 = scmp.lt.s32.totalorder %s1370_s4, %s1918_s0 }
  0x18   : > { %p1189_p2 = pnand %p1188_p1, %p1187_p0  ;;  %p1193_p5 = scmp.lt.s32.totalorder %s1191_s17, %s1186_s9 }
  0x1a   : > { %p1190_p3 = pneg %p1189_p2  ;;  %p1194_p7 = por %p1193_p5, %p1192_p4 }
  0x1c   : > { %p1195_p8 = pnand %p1194_p7, %p1190_p3 }
  0x1e   : > { %1198 = shalt.err (!%p1195_p8)
}
  0x1f   : > { %s1199_s22 = scalar_lea.vmem %s1378_s6, 4096  ;;  %s1280_s26 = smov [#allocation2]  }
  0x20   : > { %p1200_p10 = scmp.ne.s32.totalorder %s1378_s6, %s1199_s22  ;;  %s1204_s27 = sshll.u32 %s1280_s26, 4  ;;  %s1205_s27 = int_to_ptr.vmem [resolvable:$false] %s1204_s27 }
  0x21   : > { %s1206_s28 = scalar_lea.vmem %s1205_s27, 8192  ;;  %p1207_p2 = scmp.lt.s32.totalorder %s1378_s6, %s1205_s27 }
  0x22   : > { %p1202_p9 = pnand %p1200_p10, %p1188_p1  ;;  %p1208_p12 = scmp.lt.s32.totalorder %s1206_s28, %s1199_s22 }
  0x24   : > { %p1203_p0 = pneg %p1202_p9  ;;  %p1209_p11 = por %p1208_p12, %p1207_p2 }
  0x26   : > { %p1210_p6 = pnand %p1209_p11, %p1203_p0 }
  0x28   : > { %1213 = shalt.err (!%p1210_p6)
}
  0x29   : > { %s1281_s29 = smov 256   ;;  %s1282_s30 = smov 16  }
  0x2a   : > { %1044 = dma.hbm_to_vmem [thread:$0]  (!%p1374_p13), %s1370_s4, 4096, %s1378_s6, %s1380_s8, %s1281_s29, %s1281_s29, %s1282_s30  }
  0x2b   : > { %p947_p9 = scmp.ge.s32.totalorder %s1278_s15, 1  ;;  %p156_p1 = scmp.lt.s32.totalorder %s1278_s15, 3 }
  0x2d   : > { %p157_p3 = pnand %p947_p9, %p156_p1 }
  0x2f   : > { %160 = sbr.rel (%p157_p3) target bundleno = 597 (0x255), region = 32 }
  0x34   : > { %s1404_s5 = sand.u32 1, %s1270_s13   ;;  %p1938_p6 = scmp.ne.s32.totalorder %s1934_s23, 0 }
  0x35   : > { %s948_s9 = sshll.u32 %s1404_s5, 8  ;;  %s163_s10 = scalar_lea.sflag [#allocation3], %s1404_s5 }
  0x36   : > { %s1408_s11 = scalar_lea.vmem [#allocation2], %s948_s9 }
  0x37   : > { %1257 = dma.done.wait (%p1938_p6), %s163_s10, 4096  }
  0x38   : > { %1259 = vsyncadd (%p1938_p6), %s163_s10, 4294963200  ;;  %v206_v0 = vld [vmem:[%s1408_s11 + $0x8] sm:$0xff]  ;;  %v205_v1 = vld [vmem:[%s1408_s11] sm:$0xff]  ;;  %s949_s10 = sshll.u32 %s1404_s5, 7  ;;  %s956_s23 = sshll.u32 %s1328_s16, 11 }
  0x39   : > { %269 = vxpose.xlu0.b32.start [1/16] %v206_v0, 128  ;;  %237 = vxpose.xlu1.b32.start [1/16] %v205_v1, 128  ;;  %v208_v2 = vld [vmem:[%s1408_s11 + $0x18] sm:$0xff]  ;;  %v207_v3 = vld [vmem:[%s1408_s11 + $0x10] sm:$0xff]  ;;  %v210_v4 = vld [vmem:[%s1408_s11 + $0x28] sm:$0xff]  ;;  %s1869_s8 = scalar_lea.hbm %s1921_s3, %s956_s23  ;;  %s855_s16 = scalar_lea.sflag [#allocation4], %s1404_s5 }
  0x3a   : > { %v209_v5 = vld [vmem:[%s1408_s11 + $0x20] sm:$0xff]  ;;  %v212_v6 = vld [vmem:[%s1408_s11 + $0x38] sm:$0xff]  ;;  %v211_v7 = vld [vmem:[%s1408_s11 + $0x30] sm:$0xff]  ;;  %p1960_p12 = scmp.ne.s32.totalorder %s1935_s24, 0  ;;  %s1284_s19 = smov [#allocation5]  }
  0x3b   : > { %v214_v8 = vld [vmem:[%s1408_s11 + $0x48] sm:$0xff]  ;;  %v213_v9 = vld [vmem:[%s1408_s11 + $0x40] sm:$0xff]  ;;  %v216_v10 = vld [vmem:[%s1408_s11 + $0x58] sm:$0xff]  ;;  %s1218_s20 = sshll.u32 %s1284_s19, 4  ;;  %s1219_s20 = int_to_ptr.vmem [resolvable:$false] %s1218_s20 }
  0x3c   : > { %v215_v11 = vld [vmem:[%s1408_s11 + $0x50] sm:$0xff]  ;;  %v218_v12 = vld [vmem:[%s1408_s11 + $0x68] sm:$0xff]  ;;  %v217_v13 = vld [vmem:[%s1408_s11 + $0x60] sm:$0xff]  ;;  %s1220_s22 = scalar_lea.vmem %s1219_s20, 4096 }
  0x3d   : > { %270 = vxpose.xlu0.b32.cont [2/16] %v208_v2, 128  ;;  %238 = vxpose.xlu1.b32.cont [2/16] %v207_v3, 128  ;;  %v220_v14 = vld [vmem:[%s1408_s11 + $0x78] sm:$0xff]  ;;  %v219_v15 = vld [vmem:[%s1408_s11 + $0x70] sm:$0xff]  ;;  %v222_v16 = vld [vmem:[%s1408_s11 + $0x88] sm:$0xff] }
  0x3e   : > { %v221_v17 = vld [vmem:[%s1408_s11 + $0x80] sm:$0xff]  ;;  %v224_v18 = vld [vmem:[%s1408_s11 + $0x98] sm:$0xff]  ;;  %v223_v19 = vld [vmem:[%s1408_s11 + $0x90] sm:$0xff] }
  0x3f   : > { %v226_v20 = vld [vmem:[%s1408_s11 + $0xa8] sm:$0xff]  ;;  %v225_v21 = vld [vmem:[%s1408_s11 + $0xa0] sm:$0xff]  ;;  %v228_v22 = vld [vmem:[%s1408_s11 + $0xb8] sm:$0xff] }
  0x40   : > { %v227_v23 = vld [vmem:[%s1408_s11 + $0xb0] sm:$0xff]  ;;  %v230_v24 = vld [vmem:[%s1408_s11 + $0xc8] sm:$0xff]  ;;  %v229_v25 = vld [vmem:[%s1408_s11 + $0xc0] sm:$0xff] }
  0x41   : > { %271 = vxpose.xlu0.b32.cont [3/16] %v210_v4, 128  ;;  %239 = vxpose.xlu1.b32.cont [3/16] %v209_v5, 128  ;;  %v232_v26 = vld [vmem:[%s1408_s11 + $0xd8] sm:$0xff]  ;;  %v231_v27 = vld [vmem:[%s1408_s11 + $0xd0] sm:$0xff]  ;;  %v234_v28 = vld [vmem:[%s1408_s11 + $0xe8] sm:$0xff] }
  0x42   : > { %v233_v29 = vld [vmem:[%s1408_s11 + $0xe0] sm:$0xff]  ;;  %v236_v30 = vld [vmem:[%s1408_s11 + $0xf8] sm:$0xff]  ;;  %v235_v31 = vld [vmem:[%s1408_s11 + $0xf0] sm:$0xff]  ;;  %s1848_s11 = scalar_lea.vmem [#allocation5], %s949_s10 }
  0x43   : > { %s868_s4 = sshll.u32 %s1848_s11, 4  ;;  %s1871_s4 = int_to_ptr.vmem [resolvable:$true] %s868_s4 }
  0x44   : > { %s1214_s17 = scalar_lea.vmem %s1871_s4, 2048  ;;  %p1221_p5 = scmp.lt.s32.totalorder %s1871_s4, %s1219_s20 }
  0x45   : > { %272 = vxpose.xlu0.b32.cont [4/16] %v212_v6, 128  ;;  %240 = vxpose.xlu1.b32.cont [4/16] %v211_v7, 128  ;;  %p1215_p11 = scmp.ne.s32.totalorder %s1871_s4, %s1214_s17  ;;  %p1222_p7 = scmp.lt.s32.totalorder %s1220_s22, %s1214_s17 }
  0x47   : > { %p1216_p13 = pnand %p1215_p11, %p1960_p12  ;;  %p1223_p8 = por %p1222_p7, %p1221_p5 }
  0x49   : > { %273 = vxpose.xlu0.b32.cont [5/16] %v214_v8, 128  ;;  %241 = vxpose.xlu1.b32.cont [5/16] %v213_v9, 128  ;;  %p1217_p4 = pneg %p1216_p13 }
  0x4b   : > { %p1224_p10 = pnand %p1223_p8, %p1217_p4 }
  0x4d   : > { %274 = vxpose.xlu0.b32.cont [6/16] %v216_v10, 128  ;;  %242 = vxpose.xlu1.b32.cont [6/16] %v215_v11, 128 }
  0x51   : > { %275 = vxpose.xlu0.b32.cont [7/16] %v218_v12, 128  ;;  %243 = vxpose.xlu1.b32.cont [7/16] %v217_v13, 128 }
  0x55   : > { %276 = vxpose.xlu0.b32.cont [8/16] %v220_v14, 128  ;;  %244 = vxpose.xlu1.b32.cont [8/16] %v219_v15, 128 }
  0x59   : > { %277 = vxpose.xlu0.b32.cont [9/16] %v222_v16, 128  ;;  %245 = vxpose.xlu1.b32.cont [9/16] %v221_v17, 128 }
  0x5d   : > { %278 = vxpose.xlu0.b32.cont [10/16] %v224_v18, 128  ;;  %246 = vxpose.xlu1.b32.cont [10/16] %v223_v19, 128 }
  0x61   : > { %279 = vxpose.xlu0.b32.cont [11/16] %v226_v20, 128  ;;  %247 = vxpose.xlu1.b32.cont [11/16] %v225_v21, 128 }
  0x65   : > { %280 = vxpose.xlu0.b32.cont [12/16] %v228_v22, 128  ;;  %248 = vxpose.xlu1.b32.cont [12/16] %v227_v23, 128 }
  0x69   : > { %281 = vxpose.xlu0.b32.cont [13/16] %v230_v24, 128  ;;  %249 = vxpose.xlu1.b32.cont [13/16] %v229_v25, 128 }
  0x6d   : > { %282 = vxpose.xlu0.b32.cont [14/16] %v232_v26, 128  ;;  %250 = vxpose.xlu1.b32.cont [14/16] %v231_v27, 128 }
  0x71   : > { %283 = vxpose.xlu0.b32.cont [15/16] %v234_v28, 128  ;;  %251 = vxpose.xlu1.b32.cont [15/16] %v233_v29, 128 }
  0x75   : > { %284 = vxpose.xlu0.b32.end [16/16] %v236_v30, 128  ;;  %252 = vxpose.xlu1.b32.end [16/16] %v235_v31, 128 }
  0xb5   : > { %v285_v32 = vpop.trf.xlu0  ;;  %v253_v33 = vpop.trf.xlu1 }
  0xb9   : > { %v286_v34 = vpop.trf.xlu0  ;;  %v254_v35 = vpop.trf.xlu1 }
  0xba   : > { %v357_v36 = vmax.f32 %v285_v32, %v286_v34  ;;  %v301_v37 = vmax.f32 %v253_v33, %v254_v35 }
  0xbc   : > { %v358_v38 = vrot.slane %v357_v36, 4  ;;  %v302_v39 = vrot.slane %v301_v37, 4 }
  0xbd   : > { %v1446_v40 = vpop.trf.xlu0  ;;  %v1448_v41 = vpop.trf.xlu1 }
  0xbe   : > { %v359_v42 = vmax.f32 %v357_v36, %v358_v38  ;;  %v303_v43 = vmax.f32 %v301_v37, %v302_v39 }
  0xc0   : > { %v360_v44 = vrot.slane %v359_v42, 2  ;;  %v304_v45 = vrot.slane %v303_v43, 2 }
  0xc1   : > { %v288_v46 = vpop.trf.xlu0  ;;  %v256_v47 = vpop.trf.xlu1 }
  0xc2   : > { %v361_v48 = vmax.f32 %v359_v42, %v360_v44  ;;  %v305_v49 = vmax.f32 %v303_v43, %v304_v45  ;;  %v364_v50 = vmax.f32 %v1446_v40, %v288_v46  ;;  %v308_v51 = vmax.f32 %v1448_v41, %v256_v47 }
  0xc4   : > { %v362_v52 = vrot.slane %v361_v48, 1  ;;  %v306_v53 = vrot.slane %v305_v49, 1  ;;  %v365_v54 = vrot.slane %v364_v50, 4  ;;  %v309_v55 = vrot.slane %v308_v51, 4 }
  0xc5   : > { %v1452_v56 = vpop.trf.xlu0  ;;  %v1454_v57 = vpop.trf.xlu1 }
  0xc6   : > { %v363_v58 = vmax.f32 %v361_v48, %v362_v52  ;;  %v307_v59 = vmax.f32 %v305_v49, %v306_v53  ;;  %v366_v60 = vmax.f32 %v364_v50, %v365_v54  ;;  %v310_v61 = vmax.f32 %v308_v51, %v309_v55 }
  0xc8   : > { %v429_v62 = vsub.f32 %v285_v32, %v363_v58  ;;  %v430_v63 = vsub.f32 %v286_v34, %v363_v58  ;;  %v413_v0 = vsub.f32 %v253_v33, %v307_v59  ;;  %v414_v1 = vsub.f32 %v254_v35, %v307_v59 }
  0xc9   : > { %v367_v2 = vrot.slane %v366_v60, 2  ;;  %v311_v3 = vrot.slane %v310_v61, 2  ;;  %v1456_v4 = vpop.trf.xlu0  ;;  %v1458_v5 = vpop.trf.xlu1 }
  0xca   : > { %v477_v6 = vmul.f32 1.442695, %v429_v62  ;;  %v479_v7 = vmul.f32 1.442695, %v430_v63  ;;  %v445_v8 = vmul.f32 1.442695, %v413_v0  ;;  %v371_v9 = vmax.f32 %v1452_v56, %v1456_v4 }
  0xcb   : > { %v447_v10 = vmul.f32 1.442695, %v414_v1  ;;  %v368_v11 = vmax.f32 %v366_v60, %v367_v2  ;;  %v312_v12 = vmax.f32 %v310_v61, %v311_v3  ;;  %v315_v13 = vmax.f32 %v1454_v57, %v1458_v5 }
  0xcc   : > { %1090 = vpow2.f32 %v477_v6  ;;  %v372_v14 = vrot.slane %v371_v9, 4 }
  0xcd   : > { %1092 = vpow2.f32 %v479_v7  ;;  %v369_v15 = vrot.slane %v368_v11, 1  ;;  %v313_v16 = vrot.slane %v312_v12, 1  ;;  %v316_v17 = vrot.slane %v315_v13, 4  ;;  %v1464_v18 = vpop.trf.xlu0  ;;  %v1466_v19 = vpop.trf.xlu1 }
  0xce   : > { %1094 = vpow2.f32 %v445_v8  ;;  %v373_v20 = vmax.f32 %v371_v9, %v372_v14 }
  0xcf   : > { %1096 = vpow2.f32 %v447_v10  ;;  %v370_v21 = vmax.f32 %v368_v11, %v369_v15  ;;  %v314_v22 = vmax.f32 %v312_v12, %v313_v16  ;;  %v317_v23 = vmax.f32 %v315_v13, %v316_v17 }
  0xd0   : > { %v374_v24 = vrot.slane %v373_v20, 2 }
  0xd1   : > { %v431_v25 = vsub.f32 %v1446_v40, %v370_v21  ;;  %v432_v26 = vsub.f32 %v288_v46, %v370_v21  ;;  %v415_v27 = vsub.f32 %v1448_v41, %v314_v22  ;;  %v416_v28 = vsub.f32 %v256_v47, %v314_v22  ;;  %v1470_v29 = vpop.trf.xlu0  ;;  %v1472_v30 = vpop.trf.xlu1 }
  0xd2   : > { %v375_v31 = vmax.f32 %v373_v20, %v374_v24  ;;  %v318_v32 = vrot.slane %v317_v23, 2  ;;  %v378_v33 = vmax.f32 %v1464_v18, %v1470_v29  ;;  %v322_v34 = vmax.f32 %v1466_v19, %v1472_v30 }
  0xd3   : > { %v481_v35 = vmul.f32 1.442695, %v431_v25  ;;  %v483_v36 = vmul.f32 1.442695, %v432_v26  ;;  %v449_v37 = vmul.f32 1.442695, %v415_v27 }
  0xd4   : > { %v451_v38 = vmul.f32 1.442695, %v416_v28  ;;  %v376_v39 = vrot.slane %v375_v31, 1  ;;  %v319_v40 = vmax.f32 %v317_v23, %v318_v32  ;;  %v379_v41 = vrot.slane %v378_v33, 4 }
  0xd5   : > { %1098 = vpow2.f32 %v481_v35  ;;  %v323_v42 = vrot.slane %v322_v34, 4  ;;  %v1478_v43 = vpop.trf.xlu0  ;;  %v1480_v44 = vpop.trf.xlu1 }
  0xd6   : > { %1100 = vpow2.f32 %v483_v36  ;;  %v377_v45 = vmax.f32 %v375_v31, %v376_v39  ;;  %v320_v46 = vrot.slane %v319_v40, 1  ;;  %v380_v47 = vmax.f32 %v378_v33, %v379_v41 }
  0xd7   : > { %1102 = vpow2.f32 %v449_v37  ;;  %v324_v48 = vmax.f32 %v322_v34, %v323_v42 }
  0xd8   : > { %1104 = vpow2.f32 %v451_v38  ;;  %v433_v49 = vsub.f32 %v1452_v56, %v377_v45  ;;  %v434_v50 = vsub.f32 %v1456_v4, %v377_v45  ;;  %v321_v51 = vmax.f32 %v319_v40, %v320_v46 }
  0xd9   : > { %v1484_v52 = vpop.eup %1090  ;;  %v381_v53 = vrot.slane %v380_v47, 2  ;;  %v325_v54 = vrot.slane %v324_v48, 2  ;;  %v1486_v55 = vpop.trf.xlu0 }
  0xda   : > { %1939 = vst [vmem:[#allocation8_spill] sm:$0xff] %v1484_v52  ;;  %v1488_v58 = vpop.trf.xlu1  ;;  %v1490_v59 = vpop.eup %1092  ;;  %v485_v60 = vmul.f32 1.442695, %v433_v49  ;;  %v487_v61 = vmul.f32 1.442695, %v434_v50  ;;  %v417_v62 = vsub.f32 %v1454_v57, %v321_v51  ;;  %v418_v63 = vsub.f32 %v1458_v5, %v321_v51 }
  0xdb   : > { %1940 = vst [vmem:[#allocation9_spill] sm:$0xff] %v1490_v59  ;;  %v1494_v56 = vpop.eup %1094  ;;  %v1498_v0 = vadd.f32 %v1490_v59, %v1484_v52  ;;  %v382_v1 = vmax.f32 %v380_v47, %v381_v53  ;;  %v326_v2 = vmax.f32 %v324_v48, %v325_v54  ;;  %v385_v3 = vmax.f32 %v1478_v43, %v1486_v55 }
  0xdc   : > { %1941 = vst [vmem:[#allocation10_spill] sm:$0xff] %v1494_v56  ;;  %v1502_v4 = vpop.eup %1096  ;;  %1106 = vpow2.f32 %v485_v60  ;;  %v453_v6 = vmul.f32 1.442695, %v417_v62  ;;  %v455_v7 = vmul.f32 1.442695, %v418_v63  ;;  %v329_v57 = vmax.f32 %v1480_v44, %v1488_v58 }
  0xdd   : > { %1942 = vst [vmem:[#allocation11_spill] sm:$0xff] %v1502_v4  ;;  %v1508_v5 = vadd.f32 %v1502_v4, %v1494_v56  ;;  %1108 = vpow2.f32 %v487_v61  ;;  %v383_v8 = vrot.slane %v382_v1, 1  ;;  %v1510_v9 = vpop.trf.xlu0  ;;  %v327_v11 = vrot.slane %v326_v2, 1 }
  0xde   : > { %v1512_v10 = vpop.trf.xlu1  ;;  %1110 = vpow2.f32 %v453_v6  ;;  %v386_v12 = vrot.slane %v385_v3, 4  ;;  %v330_v13 = vrot.slane %v329_v57, 4  ;;  %v566_v48 = vrot.slane %v1498_v0, 4 }
  0xdf   : > { %1112 = vpow2.f32 %v455_v7  ;;  %v384_v14 = vmax.f32 %v382_v1, %v383_v8  ;;  %v328_v15 = vmax.f32 %v326_v2, %v327_v11 }
  0xe0   : > { %v387_v16 = vmax.f32 %v385_v3, %v386_v12  ;;  %v331_v21 = vmax.f32 %v329_v57, %v330_v13  ;;  %v1560_v7 = vadd.f32 %v566_v48, %v1498_v0  ;;  %v510_v57 = vrot.slane %v1508_v5, 4 }
  0xe1   : > { %v435_v17 = vsub.f32 %v1464_v18, %v384_v14  ;;  %v436_v20 = vsub.f32 %v1470_v29, %v384_v14  ;;  %v1516_v22 = vpop.trf.xlu0  ;;  %v419_v25 = vsub.f32 %v1466_v19, %v328_v15  ;;  %v420_v26 = vsub.f32 %v1472_v30, %v328_v15 }
  0xe2   : > { %v1518_v23 = vpop.trf.xlu1  ;;  %v1520_v24 = vpop.eup %1098  ;;  %v388_v27 = vrot.slane %v387_v16, 2  ;;  %v392_v18 = vmax.f32 %v1510_v9, %v1516_v22  ;;  %v332_v19 = vrot.slane %v331_v21, 2 }
  0xe3   : > { %1943 = vst [vmem:[#allocation12_spill] sm:$0xff] %v1520_v24  ;;  %v1524_v28 = vpop.eup %1100  ;;  %v489_v31 = vmul.f32 1.442695, %v435_v17  ;;  %v491_v32 = vmul.f32 1.442695, %v436_v20  ;;  %v336_v38 = vmax.f32 %v1512_v10, %v1518_v23 }
  0xe4   : > { %v1528_v29 = vpop.eup %1102  ;;  %v572_v33 = vadd.f32 %v1524_v28, %v1520_v24  ;;  %v457_v34 = vmul.f32 1.442695, %v419_v25  ;;  %v459_v35 = vmul.f32 1.442695, %v420_v26  ;;  %v389_v36 = vmax.f32 %v387_v16, %v388_v27 }
  0xe5   : > { %1944 = vst [vmem:[#allocation13_spill] sm:$0xff] %v1528_v29  ;;  %v1532_v37 = vpop.eup %1104  ;;  %1114 = vpow2.f32 %v489_v31  ;;  %v393_v30 = vrot.slane %v392_v18, 4  ;;  %v1536_v39 = vpop.trf.xlu0  ;;  %v337_v46 = vrot.slane %v336_v38, 4  ;;  %v333_v49 = vmax.f32 %v331_v21, %v332_v19 }
  0xe6   : > { %1945 = vst [vmem:[#allocation14_spill] sm:$0xff] %v1532_v37  ;;  %v1538_v40 = vpop.trf.xlu1  ;;  %v516_v41 = vadd.f32 %v1532_v37, %v1528_v29  ;;  %1116 = vpow2.f32 %v491_v32  ;;  %v390_v42 = vrot.slane %v389_v36, 1  ;;  %v573_v3 = vrot.slane %v572_v33, 4 }
  0xe7   : > { %1118 = vpow2.f32 %v457_v34  ;;  %v394_v45 = vmax.f32 %v392_v18, %v393_v30  ;;  %v338_v51 = vmax.f32 %v336_v38, %v337_v46  ;;  %v334_v11 = vrot.slane %v333_v49, 1 }
  0xe8   : > { %1120 = vpow2.f32 %v459_v35  ;;  %v1555_v63 = vmax.f32 %v389_v36, %v390_v42  ;;  %v517_v14 = vrot.slane %v516_v41, 4  ;;  %v1575_v25 = vadd.f32 %v573_v3, %v572_v33 }
  0xe9   : > { %v1542_v47 = vpop.eup %1106  ;;  %v395_v50 = vrot.slane %v394_v45, 2  ;;  %v1545_v53 = vpop.trf.xlu0  ;;  %v339_v6 = vrot.slane %v338_v51, 2  ;;  %v1579_v18 = vadd.f32 %v510_v57, %v1508_v5  ;;  %v1581_v34 = vmax.f32 %v333_v49, %v334_v11 }
  0xea   : > { %v1547_v54 = vpop.trf.xlu1  ;;  %v1549_v60 = vpop.eup %1108  ;;  %v399_v17 = vmax.f32 %v1536_v39, %v1545_v53  ;;  %v437_v0 = vsub.f32 %v1478_v43, %v1555_v63  ;;  %v1587_v43 = vadd.f32 %v517_v14, %v516_v41  ;;  %v1604_v41 = vld [vmem:[%s1919_s1] sm:$0xff] }
  0xeb   : > { %v1551_v61 = vpop.eup %1110  ;;  %v579_v62 = vadd.f32 %v1549_v60, %v1542_v47  ;;  %v396_v1 = vmax.f32 %v394_v45, %v395_v50  ;;  %v340_v16 = vmax.f32 %v338_v51, %v339_v6  ;;  %v343_v21 = vmax.f32 %v1538_v40, %v1547_v54  ;;  %1946 = vst [vmem:[#allocation15_spill] sm:$0xff] %v1604_v41  ;;  %v1609_v50 = vld [vmem:[%s1919_s1 + $0x20] sm:$0xff] }
  0xec   : > { %v1557_v2 = vpop.eup %1112  ;;  %v400_v31 = vrot.slane %v399_v17, 4  ;;  %v493_v46 = vmul.f32 1.442695, %v437_v0  ;;  %1947 = vst [vmem:[#allocation16_spill] sm:$0xff] %v1609_v50  ;;  %989 = vmatprep.mubr.f32.mxu0 %v1604_v41  ;;  %997 = vmatprep.mubr.f32.mxu1 %v1609_v50 }
  0xed   : > { %v523_v8 = vadd.f32 %v1557_v2, %v1551_v61  ;;  %v1565_v12 = vpop.trf.xlu0  ;;  %v397_v15 = vrot.slane %v396_v1, 1  ;;  %v580_v20 = vrot.slane %v579_v62, 4  ;;  %v341_v27 = vrot.slane %v340_v16, 1 }
  0xee   : > { %v1567_v13 = vpop.trf.xlu1  ;;  %v344_v35 = vrot.slane %v343_v21, 4  ;;  %v401_v38 = vmax.f32 %v399_v17, %v400_v31  ;;  %1122 = vpow2.f32 %v493_v46 }
  0xef   : > { %v398_v26 = vmax.f32 %v396_v1, %v397_v15  ;;  %v1591_v30 = vmax.f32 %v340_v16, %v341_v27  ;;  %v1597_v5 = vadd.f32 %v580_v20, %v579_v62  ;;  %v524_v17 = vrot.slane %v523_v8, 4 }
  0xf0   : > { %v345_v48 = vmax.f32 %v343_v21, %v344_v35  ;;  %v402_v11 = vrot.slane %v401_v38, 2 }
  0xf1   : > { %v1583_v36 = vpop.trf.xlu0  ;;  %v439_v3 = vsub.f32 %v1510_v9, %v398_v26  ;;  %v440_v6 = vsub.f32 %v1516_v22, %v398_v26  ;;  %v423_v9 = vsub.f32 %v1512_v10, %v1591_v30  ;;  %v582_v22 = vrot.slane %v1597_v5, 2 }
  0xf2   : > { %v1585_v19 = vpop.eup %1114  ;;  %v1593_v42 = vpop.trf.xlu1  ;;  %v406_v49 = vmax.f32 %v1565_v12, %v1583_v36  ;;  %v346_v14 = vrot.slane %v345_v48, 2  ;;  %v403_v21 = vmax.f32 %v401_v38, %v402_v11  ;;  %v525_v56 = vadd.f32 %v524_v17, %v523_v8 }
  0xf3   : > { %v1595_v45 = vpop.eup %1116  ;;  %v350_v16 = vmax.f32 %v1567_v13, %v1593_v42  ;;  %v497_v35 = vmul.f32 1.442695, %v439_v3  ;;  %v499_v32 = vmul.f32 1.442695, %v440_v6  ;;  %v465_v52 = vmul.f32 1.442695, %v423_v9 }
  0xf4   : > { %v1611_v51 = vpop.eup %1118  ;;  %v586_v1 = vadd.f32 %v1595_v45, %v1585_v19  ;;  %v407_v15 = vrot.slane %v406_v49, 4  ;;  %v347_v26 = vmax.f32 %v345_v48, %v346_v14  ;;  %v404_v33 = vrot.slane %v403_v21, 1 }
  0xf5   : > { %v1620_v57 = vpop.eup %1120  ;;  %v351_v41 = vrot.slane %v350_v16, 4  ;;  %1124 = vpow2.f32 %v497_v35  ;;  %v424_v38 = vsub.f32 %v1518_v23, %v1591_v30 }
  0xf6   : > { %v587_v20 = vrot.slane %v586_v1, 4  ;;  %v530_v0 = vadd.f32 %v1620_v57, %v1611_v51  ;;  %v408_v62 = vmax.f32 %v406_v49, %v407_v15  ;;  %v348_v50 = vrot.slane %v347_v26, 1 }
  0xf7   : > { %v405_v37 = vmax.f32 %v403_v21, %v404_v33  ;;  %v352_v24 = vmax.f32 %v350_v16, %v351_v41  ;;  %1126 = vpow2.f32 %v499_v32  ;;  %v526_v32 = vrot.slane %v525_v56, 2 }
  0xf8   : > { %v588_v27 = vadd.f32 %v587_v20, %v586_v1  ;;  %v531_v31 = vrot.slane %v530_v0, 4  ;;  %v409_v59 = vrot.slane %v408_v62, 2  ;;  %v349_v10 = vmax.f32 %v347_v26, %v348_v50 }
  0xf9   : > { %v441_v49 = vsub.f32 %v1536_v39, %v405_v37  ;;  %v442_v1 = vsub.f32 %v1545_v53, %v405_v37  ;;  %v353_v11 = vrot.slane %v352_v24, 2  ;;  %1128 = vpow2.f32 %v465_v52 }
  0xfa   : > { %v589_v4 = vrot.slane %v588_v27, 2  ;;  %v532_v29 = vadd.f32 %v531_v31, %v530_v0  ;;  %v410_v46 = vmax.f32 %v408_v62, %v409_v59  ;;  %v425_v8 = vsub.f32 %v1538_v40, %v349_v10 }
  0xfb   : > { %v426_v3 = vsub.f32 %v1547_v54, %v349_v10  ;;  %v501_v41 = vmul.f32 1.442695, %v441_v49  ;;  %v503_v14 = vmul.f32 1.442695, %v442_v1  ;;  %v421_v39 = vsub.f32 %v1480_v44, %v1581_v34  ;;  %v1640_v16 = vpop.eup %1122 }
  0xfc   : > { %v590_v48 = vadd.f32 %v589_v4, %v588_v27  ;;  %v411_v6 = vrot.slane %v410_v46, 1  ;;  %v533_v50 = vrot.slane %v532_v29, 2  ;;  %v469_v15 = vmul.f32 1.442695, %v425_v8 }
  0xfd   : > { %v471_v23 = vmul.f32 1.442695, %v426_v3  ;;  %v354_v4 = vmax.f32 %v352_v24, %v353_v11  ;;  %1130 = vpow2.f32 %v501_v41  ;;  %v467_v30 = vmul.f32 1.442695, %v424_v38 }
  0xfe   : > { %v591_v33 = vrot.slane %v590_v48, 1  ;;  %v412_v59 = vmax.f32 %v410_v46, %v411_v6  ;;  %1132 = vpow2.f32 %v503_v14  ;;  %v534_v52 = vadd.f32 %v533_v50, %v532_v29 }
  0xff   : > { %v355_v54 = vrot.slane %v354_v4, 1  ;;  %1134 = vpow2.f32 %v469_v15  ;;  %v583_v62 = vadd.f32 %v582_v22, %v1597_v5  ;;  %v1948_v44 = vsub.f32 %v1486_v55, %v1555_v63 }
 0x100   : > { %v592_v37 = vadd.f32 %v591_v33, %v590_v48  ;;  %v443_v40 = vsub.f32 %v1565_v12, %v412_v59  ;;  %v444_v53 = vsub.f32 %v1583_v36, %v412_v59  ;;  %1136 = vpow2.f32 %v471_v23  ;;  %v198_v23 = vld [vmem:[%s1920_s2 + $0x8] sm:$0xff] }
 0x101   : > { %v356_v20 = vmax.f32 %v354_v4, %v355_v54  ;;  %v495_v0 = vmul.f32 1.442695, %v1948_v44  ;;  %v422_v12 = vsub.f32 %v1488_v58, %v1581_v34  ;;  %v527_v36 = vadd.f32 %v526_v32, %v525_v56 }
 0x102   : > { %v505_v24 = vmul.f32 1.442695, %v443_v40  ;;  %v507_v17 = vmul.f32 1.442695, %v444_v53  ;;  %1138 = vrcp.f32 %v592_v37  ;;  %v535_v9 = vrot.slane %v534_v52, 1  ;;  %v1650_v63 = vpop.eup %1124 }
 0x103   : > { %v427_v29 = vsub.f32 %v1567_v13, %v356_v20  ;;  %v428_v5 = vsub.f32 %v1593_v42, %v356_v20  ;;  %v519_v22 = vrot.slane %v1587_v43, 2  ;;  %v584_v21 = vrot.slane %v583_v62, 1 }
 0x104   : > { %1140 = vpow2.f32 %v505_v24  ;;  %v461_v26 = vmul.f32 1.442695, %v421_v39  ;;  %v512_v58 = vrot.slane %v1579_v18, 2  ;;  %v536_v56 = vadd.f32 %v535_v9, %v534_v52  ;;  %v1656_v42 = vpop.eup %1126  ;;  %v199_v24 = vld [vmem:[%s1920_s2 + $0x10] sm:$0xff] }
 0x105   : > { %1142 = vpow2.f32 %v507_v17  ;;  %v473_v27 = vmul.f32 1.442695, %v427_v29  ;;  %v475_v55 = vmul.f32 1.442695, %v428_v5  ;;  %v1949_v13 = vrot.slane %v1560_v7, 2  ;;  %v202_v17 = vld [vmem:[%s1920_s2 + $0x28] sm:$0xff] }
 0x106   : > { %1144 = vpow2.f32 %v467_v30  ;;  %v463_v31 = vmul.f32 1.442695, %v422_v12  ;;  %v528_v35 = vrot.slane %v527_v36, 1  ;;  %v1950_v10 = vrot.slane %v1575_v25, 2  ;;  %v1662_v49 = vpop.eup %1128 }
 0x107   : > { %1146 = vpow2.f32 %v495_v0  ;;  %v569_v34 = vadd.f32 %v1949_v13, %v1560_v7  ;;  %v585_v46 = vadd.f32 %v584_v21, %v583_v62  ;;  %v520_v48 = vadd.f32 %v519_v22, %v1587_v43  ;;  %v200_v22 = vld [vmem:[%s1920_s2 + $0x18] sm:$0xff] }
 0x108   : > { %1148 = vpow2.f32 %v473_v27  ;;  %v576_v38 = vadd.f32 %v1950_v10, %v1575_v25  ;;  %v529_v1 = vadd.f32 %v528_v35, %v527_v36  ;;  %v513_v33 = vadd.f32 %v512_v58, %v1579_v18  ;;  %v197_v18 = vld [vmem:[%s1920_s2] sm:$0xff]  ;;  %v204_v21 = vld [vmem:[%s1920_s2 + $0x38] sm:$0xff] }
 0x109   : > { %1150 = vpow2.f32 %v475_v55  ;;  %v521_v7 = vrot.slane %v520_v48, 1  ;;  %v570_v11 = vrot.slane %v569_v34, 1  ;;  %v1283_v40 = vmov 0  }
 0x10a   : > { %1152 = vpow2.f32 %v461_v26  ;;  %v577_v8 = vrot.slane %v576_v38, 1  ;;  %v1664_v3 = vpop.eup %1130  ;;  %v514_v15 = vrot.slane %v513_v33, 1  ;;  %1089 = vset.pattern.permute.xlu1 %v1283_v40  ;;  %1088 = vset.pattern.permute.xlu0 %v1283_v40  ;;  %v600_v44 = vadd.f32 %v1656_v42, %v1650_v63 }
 0x10b   : > { %1154 = vrcp.f32 %v536_v56  ;;  %v1667_v50 = vpop.eup %1132  ;;  %v522_v25 = vadd.f32 %v521_v7, %v520_v48  ;;  %v571_v14 = vadd.f32 %v570_v11, %v569_v34  ;;  %676 = vperm.xlu1 %1089, %v198_v23   ;;  %671 = vperm.xlu0 %1088, %v197_v18   ;;  %v201_v7 = vld [vmem:[%s1920_s2 + $0x20] sm:$0xff] }
 0x10c   : > { %1156 = vpow2.f32 %v463_v31  ;;  %v578_v6 = vadd.f32 %v577_v8, %v576_v38  ;;  %v1669_v41 = vpop.eup %1134  ;;  %v607_v43 = vadd.f32 %v1667_v50, %v1664_v3  ;;  %v515_v37 = vadd.f32 %v514_v15, %v513_v33 }
 0x10d   : > { %1158 = vrcp.f32 %v585_v46  ;;  %v1679_v59 = vpop.eup %1136  ;;  %v601_v56 = vrot.slane %v600_v44, 4 }
 0x10e   : > { %1160 = vrcp.f32 %v529_v1  ;;  %v608_v32 = vrot.slane %v607_v43, 4  ;;  %v551_v39 = vadd.f32 %v1679_v59, %v1669_v41 }
 0x10f   : > { %1162 = vrcp.f32 %v578_v6  ;;  %v1139_v4 = vpop.eup %1138  ;;  %681 = vperm.xlu1 %1089, %v199_v24   ;;  %696 = vperm.xlu0 %1088, %v202_v17   ;;  %v1953_v24 = vld [vmem:[#allocation13_spill] sm:$0xff]  ;;  %v203_v17 = vld [vmem:[%s1920_s2 + $0x30] sm:$0xff] }
 0x110   : > { %1164 = vrcp.f32 %v522_v25  ;;  %v1686_v54 = vmul.f32 %v1139_v4, %v1595_v45  ;;  %v1689_v30 = vmul.f32 %v1139_v4, %v1585_v19  ;;  %v552_v62 = vrot.slane %v551_v39, 4 }
 0x111   : > { %v1683_v53 = vpop.eup %1140  ;;  %1166 = vrcp.f32 %v571_v14  ;;  %v609_v0 = vadd.f32 %v608_v32, %v607_v43  ;;  %v602_v43 = vadd.f32 %v601_v56, %v600_v44 }
 0x112   : > { %v1691_v52 = vpop.eup %1142  ;;  %1168 = vrcp.f32 %v515_v37  ;;  %v553_v9 = vadd.f32 %v552_v62, %v551_v39  ;;  %v1952_v62 = vld [vmem:[#allocation14_spill] sm:$0xff] }
 0x113   : > { %v1699_v20 = vpop.eup %1144  ;;  %v614_v19 = vadd.f32 %v1691_v52, %v1683_v53  ;;  %v610_v13 = vrot.slane %v609_v0, 2  ;;  %686 = vperm.xlu1 %1089, %v200_v22   ;;  %706 = vperm.xlu0 %1088, %v204_v21   ;;  %v603_v22 = vrot.slane %v602_v43, 2 }
 0x114   : > { %v1703_v45 = vpop.eup %1146  ;;  %v544_v5 = vadd.f32 %v1699_v20, %v1662_v49  ;;  %v554_v8 = vrot.slane %v553_v9, 2 }
 0x115   : > { %v1707_v12 = vpop.eup %1148  ;;  %v615_v36 = vrot.slane %v614_v19, 4  ;;  %v593_v48 = vadd.f32 %v1703_v45, %v1640_v16  ;;  %v611_v14 = vadd.f32 %v610_v13, %v609_v0 }
 0x116   : > { %v1709_v29 = vpop.eup %1150  ;;  %v545_v1 = vrot.slane %v544_v5, 4 }
 0x117   : > { %v1719_v26 = vpop.eup %1152  ;;  %v616_v27 = vadd.f32 %v615_v36, %v614_v19  ;;  %v558_v55 = vadd.f32 %v1709_v29, %v1707_v12  ;;  %691 = vperm.xlu1 %1089, %v201_v7   ;;  %v555_v36 = vadd.f32 %v554_v8, %v553_v9  ;;  %v612_v21 = vrot.slane %v611_v14, 1  ;;  %v1957_v7 = vld [vmem:[#allocation10_spill] sm:$0xff] }
 0x118   : > { %v1155_v58 = vpop.eup %1154  ;;  %v546_v19 = vadd.f32 %v545_v1, %v544_v5 }
 0x119   : > { %v1723_v34 = vpop.eup %1156  ;;  %v559_v31 = vrot.slane %v558_v55, 4  ;;  %v617_v35 = vrot.slane %v616_v27, 2  ;;  %v1726_v10 = vmul.f32 %v1155_v58, %v1620_v57  ;;  %v1729_v38 = vmul.f32 %v1155_v58, %v1611_v51  ;;  %v1955_v58 = vld [vmem:[#allocation8_spill] sm:$0xff] }
 0x11a   : > { %v1159_v46 = vpop.eup %1158  ;;  %v537_v40 = vadd.f32 %v1723_v34, %v1719_v26  ;;  %v547_v9 = vrot.slane %v546_v19, 2 }
 0x11b   : > { %v1161_v6 = vpop.eup %1160  ;;  %v560_v11 = vadd.f32 %v559_v31, %v558_v55  ;;  %v618_v33 = vadd.f32 %v617_v35, %v616_v27  ;;  %v1737_v57 = vmul.f32 %v1159_v46, %v1549_v60  ;;  %v1740_v51 = vmul.f32 %v1159_v46, %v1542_v47  ;;  %v1951_v60 = vld [vmem:[#allocation12_spill] sm:$0xff]  ;;  %v1954_v27 = vld [vmem:[#allocation9_spill] sm:$0xff]  ;;  %701 = vperm.xlu1 %1089, %v203_v17   ;;  %v1956_v35 = vld [vmem:[#allocation11_spill] sm:$0xff] }
 0x11c   : > { %v1163_v25 = vpop.eup %1162  ;;  %v1743_v15 = vmul.f32 %v1161_v6, %v1557_v2  ;;  %v1746_v23 = vmul.f32 %v1161_v6, %v1551_v61  ;;  %v594_v47 = vrot.slane %v593_v48, 4  ;;  %v538_v1 = vrot.slane %v537_v40, 4 }
 0x11d   : > { %v1165_v18 = vpop.eup %1164  ;;  %v619_v4 = vrot.slane %v618_v33, 1  ;;  %v561_v32 = vrot.slane %v560_v11, 2  ;;  %v1749_v39 = vmul.f32 %v1163_v25, %v1524_v28  ;;  %v1752_v37 = vmul.f32 %v1163_v25, %v1951_v60 }
 0x11e   : > { %v1757_v2 = vmul.f32 %v1165_v18, %v1952_v62  ;;  %v1760_v61 = vmul.f32 %v1165_v18, %v1953_v24  ;;  %v1167_v28 = vpop.eup %1166  ;;  %v556_v6 = vrot.slane %v555_v36, 1  ;;  %v604_v25 = vadd.f32 %v603_v22, %v602_v43 }
 0x11f   : > { %v620_v44 = vadd.f32 %v619_v4, %v618_v33  ;;  %v562_v0 = vadd.f32 %v561_v32, %v560_v11  ;;  %v1766_v55 = vmul.f32 %v1167_v28, %v1954_v27  ;;  %v1769_v56 = vmul.f32 %v1167_v28, %v1955_v58  ;;  %v1169_v13 = vpop.eup %1168 }
 0x120   : > { %v1772_v46 = vmul.f32 %v1169_v13, %v1956_v35  ;;  %v1775_v5 = vmul.f32 %v1169_v13, %v1957_v7  ;;  %v595_v11 = vadd.f32 %v594_v47, %v593_v48  ;;  %v613_v33 = vadd.f32 %v612_v21, %v611_v14 }
 0x121   : > { %1170 = vrcp.f32 %v620_v44  ;;  %v563_v31 = vrot.slane %v562_v0, 1  ;;  %v539_v18 = vadd.f32 %v538_v1, %v537_v40  ;;  %v557_v4 = vadd.f32 %v556_v6, %v555_v36 }
 0x122   : > { %v548_v32 = vadd.f32 %v547_v9, %v546_v19  ;;  %v596_v60 = vrot.slane %v595_v11, 2  ;;  %v605_v62 = vrot.slane %v604_v25, 1 }
 0x123   : > { %v564_v8 = vadd.f32 %v563_v31, %v562_v0  ;;  %v540_v24 = vrot.slane %v539_v18, 2 }
 0x124   : > { %v549_v17 = vrot.slane %v548_v32, 1  ;;  %v606_v28 = vadd.f32 %v605_v62, %v604_v25  ;;  %v597_v44 = vadd.f32 %v596_v60, %v595_v11 }
 0x125   : > { %1172 = vrcp.f32 %v564_v8  ;;  %v541_v13 = vadd.f32 %v540_v24, %v539_v18 }
 0x126   : > { %1174 = vrcp.f32 %v613_v33  ;;  %v550_v0 = vadd.f32 %v549_v17, %v548_v32  ;;  %v598_v48 = vrot.slane %v597_v44, 1 }
 0x127   : > { %1176 = vrcp.f32 %v557_v4  ;;  %v542_v47 = vrot.slane %v541_v13, 1 }
 0x128   : > { %1178 = vrcp.f32 %v606_v28  ;;  %v599_v19 = vadd.f32 %v598_v48, %v597_v44 }
 0x129   : > { %1180 = vrcp.f32 %v550_v0  ;;  %v543_v22 = vadd.f32 %v542_v47, %v541_v13 }
 0x12a   : > { %1182 = vrcp.f32 %v599_v19 }
 0x12b   : > { %1184 = vrcp.f32 %v543_v22 }
 0x12e   : > { %v1171_v27 = vpop.eup %1170 }
 0x12f   : > { %v668_v58 = vmul.f32 %v1171_v27, %v1691_v52  ;;  %v667_v40 = vmul.f32 %v1171_v27, %v1683_v53 }
 0x131   : > { %957 = vmatprep.subr.mxu0 %v668_v58  ;;  %1005 = vmatprep.subr.mxu1 %v668_v58 }
 0x132   : > { %v1173_v43 = vpop.eup %1172 }
 0x133   : > { %v644_v14 = vmul.f32 %v1173_v43, %v1709_v29  ;;  %v1175_v36 = vpop.eup %1174  ;;  %v643_v52 = vmul.f32 %v1173_v43, %v1707_v12 }
 0x134   : > { %v1177_v21 = vpop.eup %1176  ;;  %v665_v31 = vmul.f32 %v1175_v36, %v1667_v50  ;;  %v664_v53 = vmul.f32 %v1175_v36, %v1664_v3 }
 0x135   : > { %958 = vmatpush3.xpose.msra.mxu0 %v644_v14  ;;  %1021 = vmatpush3.xpose.msra.mxu1 %v644_v14  ;;  %v641_v29 = vmul.f32 %v1177_v21, %v1679_v59  ;;  %v1179_v35 = vpop.eup %1178  ;;  %v640_v12 = vmul.f32 %v1177_v21, %v1669_v41 }
 0x136   : > { %959 = vmatprep.subr.mxu0 %v667_v40  ;;  %1006 = vmatprep.subr.mxu1 %v667_v40  ;;  %v1181_v7 = vpop.eup %1180  ;;  %v662_v50 = vmul.f32 %v1179_v35, %v1656_v42  ;;  %v661_v59 = vmul.f32 %v1179_v35, %v1650_v63 }
 0x137   : > { %v638_v1 = vmul.f32 %v1181_v7, %v1699_v20  ;;  %v1183_v9 = vpop.eup %1182  ;;  %v637_v3 = vmul.f32 %v1181_v7, %v1662_v49  ;;  %v194_v49 = vld [vmem:[%s1919_s1 + $0x28] sm:$0xff] }
 0x138   : > { %v1185_v8 = vpop.eup %1184  ;;  %v659_v41 = vmul.f32 %v1183_v9, %v1703_v45  ;;  %v658_v20 = vmul.f32 %v1183_v9, %v1640_v16  ;;  %v190_v16 = vld [vmem:[%s1919_s1 + $0x8] sm:$0xff]  ;;  %v191_v45 = vld [vmem:[%s1919_s1 + $0x10] sm:$0xff] }
 0x139   : > { %960 = vmatpush3.xpose.msra.mxu0 %v643_v52  ;;  %1022 = vmatpush3.xpose.msra.mxu1 %v643_v52  ;;  %v635_v42 = vmul.f32 %v1185_v8, %v1723_v34  ;;  %v634_v63 = vmul.f32 %v1185_v8, %v1719_v26  ;;  %v195_v26 = vld [vmem:[%s1919_s1 + $0x30] sm:$0xff]  ;;  %v192_v34 = vld [vmem:[%s1919_s1 + $0x18] sm:$0xff] }
 0x13a   : > { %961 = vmatprep.subr.mxu0 %v665_v31  ;;  %1007 = vmatprep.subr.mxu1 %v665_v31 }
 0x13d   : > { %962 = vmatpush3.xpose.msra.mxu0 %v641_v29  ;;  %1023 = vmatpush3.xpose.msra.mxu1 %v641_v29 }
 0x13e   : > { %963 = vmatprep.subr.mxu0 %v664_v53  ;;  %1008 = vmatprep.subr.mxu1 %v664_v53 }
 0x141   : > { %964 = vmatpush3.xpose.msra.mxu0 %v640_v12  ;;  %1024 = vmatpush3.xpose.msra.mxu1 %v640_v12 }
 0x142   : > { %965 = vmatprep.subr.mxu0 %v662_v50  ;;  %1009 = vmatprep.subr.mxu1 %v662_v50 }
 0x145   : > { %966 = vmatpush3.xpose.msra.mxu0 %v638_v1  ;;  %1025 = vmatpush3.xpose.msra.mxu1 %v638_v1 }
 0x146   : > { %967 = vmatprep.subr.mxu0 %v661_v59  ;;  %1010 = vmatprep.subr.mxu1 %v661_v59 }
 0x149   : > { %968 = vmatpush3.xpose.msra.mxu0 %v637_v3  ;;  %1026 = vmatpush3.xpose.msra.mxu1 %v637_v3 }
 0x14a   : > { %969 = vmatprep.subr.mxu0 %v659_v41  ;;  %1011 = vmatprep.subr.mxu1 %v659_v41 }
 0x14d   : > { %970 = vmatpush3.xpose.msra.mxu0 %v635_v42  ;;  %1027 = vmatpush3.xpose.msra.mxu1 %v635_v42 }
 0x14e   : > { %971 = vmatprep.subr.mxu0 %v658_v20  ;;  %1012 = vmatprep.subr.mxu1 %v658_v20 }
 0x151   : > { %972 = vmatpush3.xpose.msra.mxu0 %v634_v63  ;;  %1028 = vmatpush3.xpose.msra.mxu1 %v634_v63 }
 0x152   : > { %973 = vmatprep.subr.mxu0 %v1686_v54  ;;  %1013 = vmatprep.subr.mxu1 %v1686_v54  ;;  %v1958_v54 = vld [vmem:[#allocation15_spill] sm:$0xff] }
 0x155   : > { %974 = vmatpush3.xpose.msra.mxu0 %v1726_v10  ;;  %1029 = vmatpush3.xpose.msra.mxu1 %v1726_v10  ;;  %v196_v10 = vld [vmem:[%s1919_s1 + $0x38] sm:$0xff] }
 0x156   : > { %975 = vmatprep.subr.mxu0 %v1689_v30  ;;  %1014 = vmatprep.subr.mxu1 %v1689_v30  ;;  %v1959_v30 = vld [vmem:[#allocation16_spill] sm:$0xff] }
 0x159   : > { %976 = vmatpush3.xpose.msra.mxu0 %v1729_v38  ;;  %1030 = vmatpush3.xpose.msra.mxu1 %v1729_v38 }
 0x15a   : > { %977 = vmatprep.subr.mxu0 %v1737_v57  ;;  %1015 = vmatprep.subr.mxu1 %v1737_v57 }
 0x15d   : > { %978 = vmatpush3.xpose.msra.mxu0 %v1743_v15  ;;  %1031 = vmatpush3.xpose.msra.mxu1 %v1743_v15 }
 0x15e   : > { %979 = vmatprep.subr.mxu0 %v1740_v51  ;;  %1016 = vmatprep.subr.mxu1 %v1740_v51 }
 0x161   : > { %980 = vmatpush3.xpose.msra.mxu0 %v1746_v23  ;;  %1032 = vmatpush3.xpose.msra.mxu1 %v1746_v23 }
 0x162   : > { %981 = vmatprep.subr.mxu0 %v1749_v39  ;;  %1017 = vmatprep.subr.mxu1 %v1749_v39 }
 0x165   : > { %982 = vmatpush3.xpose.msra.mxu0 %v1757_v2  ;;  %1033 = vmatpush3.xpose.msra.mxu1 %v1757_v2 }
 0x166   : > { %983 = vmatprep.subr.mxu0 %v1752_v37  ;;  %1018 = vmatprep.subr.mxu1 %v1752_v37 }
 0x169   : > { %984 = vmatpush3.xpose.msra.mxu0 %v1760_v61  ;;  %1034 = vmatpush3.xpose.msra.mxu1 %v1760_v61 }
 0x16a   : > { %985 = vmatprep.subr.mxu0 %v1766_v55  ;;  %1019 = vmatprep.subr.mxu1 %v1766_v55 }
 0x16d   : > { %986 = vmatpush3.xpose.msra.mxu0 %v1772_v46  ;;  %1035 = vmatpush3.xpose.msra.mxu1 %v1772_v46 }
 0x16e   : > { %987 = vmatprep.subr.mxu0 %v1769_v56  ;;  %1020 = vmatprep.subr.mxu1 %v1769_v56 }
 0x171   : > { %988 = vmatpush3.xpose.msra.mxu0 %v1775_v5  ;;  %1036 = vmatpush3.xpose.msra.mxu1 %v1775_v5 }
 0x174   : > { %990 = vmatmul.mubr.f32.vlgmr.msra.gmra.mxu0 %v1958_v54  ;;  %998 = vmatmul.mubr.f32.vlgmr.msra.gmra.mxu1 %v1959_v30 }
 0x175   : > { %991 = vmatprep.mubr.f32.mxu0 %v190_v16  ;;  %999 = vmatprep.mubr.f32.mxu1 %v194_v49 }
 0x178   : > { %992 = vmatmul.mubr.f32.gmra.mxu0 %v190_v16  ;;  %1000 = vmatmul.mubr.f32.gmra.mxu1 %v194_v49 }
 0x179   : > { %993 = vmatprep.mubr.f32.mxu0 %v191_v45  ;;  %1001 = vmatprep.mubr.f32.mxu1 %v195_v26 }
 0x17c   : > { %994 = vmatmul.mubr.f32.gmra.mxu0 %v191_v45  ;;  %1002 = vmatmul.mubr.f32.gmra.mxu1 %v195_v26 }
 0x17d   : > { %995 = vmatprep.mubr.f32.mxu0 %v192_v34  ;;  %1003 = vmatprep.mubr.f32.mxu1 %v196_v10 }
 0x180   : > { %996 = vmatmul.mubr.f32.gmra.mxu0 %v192_v34  ;;  %1004 = vmatmul.mubr.f32.gmra.mxu1 %v196_v10 }
 0x186   : > { %v677_v38 = vpop.permute.xlu1 %676  ;;  %v672_v15 = vpop.permute.xlu0 %671 }
 0x18a   : > { %v682_v57 = vpop.permute.xlu1 %681  ;;  %v697_v6 = vpop.permute.xlu0 %696 }
 0x18e   : > { %v1845_v51 = vpop.permute.xlu1 %686  ;;  %v707_v52 = vpop.permute.xlu0 %706 }
 0x192   : > { %v692_v23 = vpop.permute.xlu1 %691 }
 0x196   : > { %v702_v28 = vpop.permute.xlu1 %701 }
 0x234   : > { %v775_v39 = vpop.f32.mrf.mxu0  ;;  %v799_v37 = vpop.f32.mrf.mxu1 }
 0x235   : > { %v776_v2 = vadd.f32 %v775_v39, %v672_v15  ;;  %v800_v61 = vadd.f32 %v799_v37, %v692_v23 }
 0x236   : > { %v777_v55 = vpop.f32.mrf.mxu0  ;;  %v801_v56 = vpop.f32.mrf.mxu1 }
 0x237   : > { %v822_v46 = vmax.f32 %v776_v2, 0.0  ;;  %v830_v5 = vmax.f32 %v800_v61, 0.0  ;;  %v778_v11 = vadd.f32 %v777_v55, %v672_v15  ;;  %v802_v33 = vadd.f32 %v801_v56, %v692_v23 }
 0x238   : > { %v781_v25 = vpop.f32.mrf.mxu0  ;;  %v805_v18 = vpop.f32.mrf.mxu1 }
 0x239   : > { %838 = vst [vmem:[%s1848_s11] sm:$0xff] %v822_v46  ;;  %846 = vst [vmem:[%s1848_s11 + $0x40] sm:$0xff] %v830_v5  ;;  %v823_v4 = vmax.f32 %v778_v11, 0.0  ;;  %v831_v32 = vmax.f32 %v802_v33, 0.0  ;;  %v782_v60 = vadd.f32 %v781_v25, %v677_v38  ;;  %v806_v62 = vadd.f32 %v805_v18, %v697_v6 }
 0x23a   : > { %v783_v24 = vpop.f32.mrf.mxu0  ;;  %v807_v17 = vpop.f32.mrf.mxu1 }
 0x23b   : > { %839 = vst [vmem:[%s1848_s11 + $0x8] sm:$0xff] %v823_v4  ;;  %847 = vst [vmem:[%s1848_s11 + $0x48] sm:$0xff] %v831_v32  ;;  %v824_v44 = vmax.f32 %v782_v60, 0.0  ;;  %v832_v27 = vmax.f32 %v806_v62, 0.0  ;;  %v784_v58 = vadd.f32 %v783_v24, %v677_v38  ;;  %v808_v0 = vadd.f32 %v807_v17, %v697_v6 }
 0x23c   : > { %v787_v13 = vpop.f32.mrf.mxu0  ;;  %v811_v48 = vpop.f32.mrf.mxu1 }
 0x23d   : > { %840 = vst [vmem:[%s1848_s11 + $0x10] sm:$0xff] %v824_v44  ;;  %848 = vst [vmem:[%s1848_s11 + $0x50] sm:$0xff] %v832_v27  ;;  %v825_v43 = vmax.f32 %v784_v58, 0.0  ;;  %v833_v14 = vmax.f32 %v808_v0, 0.0  ;;  %v788_v47 = vadd.f32 %v787_v13, %v682_v57  ;;  %v812_v40 = vadd.f32 %v811_v48, %v702_v28 }
 0x23e   : > { %v789_v19 = vpop.f32.mrf.mxu0  ;;  %v813_v36 = vpop.f32.mrf.mxu1 }
 0x23f   : > { %841 = vst [vmem:[%s1848_s11 + $0x18] sm:$0xff] %v825_v43  ;;  %849 = vst [vmem:[%s1848_s11 + $0x58] sm:$0xff] %v833_v14  ;;  %v826_v22 = vmax.f32 %v788_v47, 0.0  ;;  %v834_v21 = vmax.f32 %v812_v40, 0.0  ;;  %v790_v31 = vadd.f32 %v789_v19, %v682_v57  ;;  %v814_v29 = vadd.f32 %v813_v36, %v702_v28 }
 0x240   : > { %v793_v53 = vpop.f32.mrf.mxu0  ;;  %v817_v35 = vpop.f32.mrf.mxu1 }
 0x241   : > { %842 = vst [vmem:[%s1848_s11 + $0x20] sm:$0xff] %v826_v22  ;;  %850 = vst [vmem:[%s1848_s11 + $0x60] sm:$0xff] %v834_v21  ;;  %v827_v12 = vmax.f32 %v790_v31, 0.0  ;;  %v835_v7 = vmax.f32 %v814_v29, 0.0  ;;  %v794_v50 = vadd.f32 %v793_v53, %v1845_v51  ;;  %v818_v1 = vadd.f32 %v817_v35, %v707_v52 }
 0x242   : > { %v795_v59 = vpop.f32.mrf.mxu0  ;;  %v819_v9 = vpop.f32.mrf.mxu1 }
 0x243   : > { %843 = vst [vmem:[%s1848_s11 + $0x28] sm:$0xff] %v827_v12  ;;  %851 = vst [vmem:[%s1848_s11 + $0x68] sm:$0xff] %v835_v7  ;;  %v828_v3 = vmax.f32 %v794_v50, 0.0  ;;  %v836_v8 = vmax.f32 %v818_v1, 0.0  ;;  %v796_v41 = vadd.f32 %v795_v59, %v1845_v51  ;;  %v820_v42 = vadd.f32 %v819_v9, %v707_v52 }
 0x245   : > { %844 = vst [vmem:[%s1848_s11 + $0x30] sm:$0xff] %v828_v3  ;;  %852 = vst [vmem:[%s1848_s11 + $0x70] sm:$0xff] %v836_v8  ;;  %v829_v20 = vmax.f32 %v796_v41, 0.0  ;;  %v837_v63 = vmax.f32 %v820_v42, 0.0 }
 0x247   : > { %845 = vst [vmem:[%s1848_s11 + $0x38] sm:$0xff] %v829_v20  ;;  %853 = vst [vmem:[%s1848_s11 + $0x78] sm:$0xff] %v837_v63 }
 0x248   : > { %1227 = shalt.err (!%p1224_p10)
}
 0x249   : > { %s1228_s26 = scalar_lea.hbm %s1869_s8, 2048  ;;  %s1232_s29 = scalar_lea.hbm %s1921_s3, 4096 }
 0x24a   : > { %p1229_p0 = scmp.ne.s32.totalorder %s1869_s8, %s1228_s26  ;;  %p1233_p1 = scmp.lt.s32.totalorder %s1869_s8, %s1921_s3 }
 0x24b   : > { %p1234_p3 = scmp.lt.s32.totalorder %s1232_s29, %s1228_s26 }
 0x24c   : > { %p1230_p2 = pnand %p1229_p0, %p1960_p12 }
 0x24d   : > { %p1235_p6 = por %p1234_p3, %p1233_p1 }
 0x24e   : > { %p1231_p9 = pneg %p1230_p2 }
 0x250   : > { %p1236_p11 = pnand %p1235_p6, %p1231_p9 }
 0x252   : > { %1239 = shalt.err (!%p1236_p11)
}
 0x253   : > { %s1285_s10 = smov 256   ;;  %s1286_s11 = smov 16  }
 0x254   : > { %1039 = dma.vmem_to_hbm [thread:$0]  (%p1960_p12), %s1871_s4, 2048, %s1869_s8, %s855_s16, %s1285_s10, %s1285_s10, %s1286_s11  }
 0x255 PF: > { %s883_s23 = sand.u32 1, %s1266_s12   ;;  %p1961_p13 = scmp.ne.s32.totalorder %s1936_s25, 0 }
 0x256   : > { %p1962_p4 = scmp.ge.s32.totalorder %s1278_s15, 2  ;;  %s884_s6 = scalar_lea.sflag [#allocation4], %s883_s23 }
 0x258   : > { %p1046_p5 = pnand %p1962_p4, %p1961_p13 }
 0x25a   : > { %p1047_p7 = pneg %p1046_p5 }
 0x25c   : > { %1261 = dma.done.wait (%p1047_p7), %s884_s6, 2048  }
 0x25d   : > { %1263 = vsyncadd (%p1047_p7), %s884_s6, 4294965248  ;;  %p16_p8 = scmp.ge.s32.totalorder %s1332_s18, 4   ;;  %s1963_s12 = smov %s1270_s13 }
 0x25e   : > { %s1964_s13 = smov %s1274_s14  ;;  %s1965_s14 = smov %s1344_s21 }
 0x25f   : > { %s1966_s15 = smov %s1332_s18  ;;  %18 = sbr.rel (!%p16_p8) target bundleno = 5 (0x5), region = 77 }
 0x264   :  { %889 = vsyncpa [#allocation3], 1 }
 0x265   :  { %891 = vsyncpa [#allocation3 + $0x1], 1 }
 0x266   :  { %892 = vsyncpa [#allocation4], 1 }
 0x267   :  { %894 = vsyncpa [#allocation4 + $0x1], 1 }

</bundles_post_ra>
